<compile_context>
chip_gen: v7x
topology: tpu7x:2x2x1
jax: 0.10.0
libtpu: 0.0.40
codegen_flags: <defaults>
</compile_context>

<pallas_src>
import functools

import jax
import jax.numpy as jnp
from jax.experimental import pallas as pl
from jax.experimental.pallas import tpu as pltpu


# ---------------------------------------------------------------------------
# Kernel
# ---------------------------------------------------------------------------
def _stgcn_block_kernel(x_ref, a_ref, w1_ref, b1_ref, th_ref, w2_ref, b2_ref,
                        gamma_ref, beta_ref, o_ref, *, B, N, valid_out_lanes,
                        eps):
    f32 = jnp.float32
    bf16 = jnp.bfloat16

    def gated_tconv(h, w_ref, b_ref):
        # One fused bf16 MXU matmul for all 3 branches x 3 taps. Each branch
        # slab is 128-lane padded, so the P/Q/R slices are vreg-aligned (no
        # lane shuffles / masked stores) and padded lanes stay exactly 0.
        slab = w_ref.shape[1] // 3
        y = jnp.dot(h.astype(bf16), w_ref[...],
                    preferred_element_type=f32) + b_ref[...]
        p = y[:, :slab]
        q = y[:, slab:2 * slab]
        r = y[:, 2 * slab:]
        return jnp.maximum(p * jax.nn.sigmoid(q) + r, 0.0)   # f32 elementwise

    x = x_ref[...]                                           # (B*N, T*Cin) f32

    # Temporal conv 1 (gated).                               # (B*N, S1)
    t1 = gated_tconv(x, w1_ref, b1_ref)

    # Graph conv: per-batch (N, N) A_hat matmul -- no kron(I_B, A_hat), no
    # zero-block MACs, O(N^2) operator memory.  For large B this loop becomes
    # a "parallel" grid axis instead.
    t1b = t1.astype(bf16)
    lfs = jnp.concatenate(
        [jnp.dot(a_ref[...], t1b[b * N:(b + 1) * N, :],
                 preferred_element_type=f32) for b in range(B)], axis=0)

    # Theta1 (block-diagonal over time, lane-padded) + ReLU. # (B*N, S_mid)
    t2 = jnp.maximum(
        jnp.dot(lfs.astype(bf16), th_ref[...], preferred_element_type=f32),
        0.0)

    # Temporal conv 2 (gated).                               # (B*N, S2)
    t3 = gated_tconv(t2, w2_ref, b2_ref)

    # BatchNorm2d(num_nodes): training-mode batch stats (biased variance),
    # two-pass (mean, then masked centered variance) so large sample counts
    # cannot cancel catastrophically.  Padded lanes are exactly 0 and are
    # excluded from the variance via the lane mask; the divisor only counts
    # valid (time, channel) lanes.
    s2 = t3.shape[1]
    inv_cnt = 1.0 / float(B * valid_out_lanes)
    t3_3d = t3.reshape(B, N, s2)
    lane_valid = (jax.lax.broadcasted_iota(jnp.int32, (1, 1, s2), 2)
                  < valid_out_lanes)
    mean_n = jnp.sum(jnp.sum(t3_3d, axis=0), axis=-1,
                     keepdims=True) * inv_cnt                # (N, 1)
    cent = jnp.where(lane_valid, t3_3d - mean_n[None, :, :], 0.0)
    var_n = jnp.sum(jnp.sum(cent * cent, axis=0), axis=-1,
                    keepdims=True) * inv_cnt                 # (N, 1)
    scale_n = jax.lax.rsqrt(var_n + eps) * gamma_ref[...]    # (N, 1)
    shift_n = beta_ref[...] - mean_n * scale_n               # (N, 1)

    # TODO(synk): PyTorch training-mode BN also updates running_mean /
    # running_var buffers; that side effect does not change the forward output
    # and is not modeled here.

    # Single dense, lane-aligned store of the whole output slab (padded lanes
    # hold shift_n and are sliced off on the host).
    out = t3_3d * scale_n[None, :, :] + shift_n[None, :, :]
    o_ref[...] = out.reshape(B * N, s2).astype(o_ref.dtype)


# ---------------------------------------------------------------------------
# Host-side static weight packing (layout plumbing, no activation compute)
# ---------------------------------------------------------------------------
def _pad128(n):
    return ((n + 127) // 128) * 128


def _tconv_weight_matrix(w, t_in, in_rows, slab):
    """w: (3, K, Ci, Co) with w[c, k, ci, co] = torch_conv_c.weight[co, ci, 0, k].
    Input lanes: t*Ci + ci (rows >= t_in*Ci stay zero -> padded input lanes).
    Output lanes: 3 branch slabs, each zero-padded to `slab` (multiple of 128),
    ordered (t_out, co) within a slab, realizing all 3 convs x 3 taps as one
    lane-aligned matmul."""
    n_branch, K, Ci, Co = w.shape
    To = t_in - K + 1
    m = jnp.zeros((in_rows, n_branch * slab), jnp.float32)
    for c in range(n_branch):
        for tp in range(To):
            for k in range(K):
                t = tp + k
                col = c * slab + tp * Co
                m = m.at[t * Ci:(t + 1) * Ci, col:col + Co].set(w[c, k])
    return m


def _tconv_bias_vector(b, To, slab):
    """b: (3, Co) -> (1, 3*slab); padded lanes are exactly 0 so padded
    activation lanes stay 0 through relu(p*sigmoid(q)+r)."""
    n_branch, Co = b.shape
    v = jnp.zeros((1, n_branch * slab), jnp.float32)
    for c in range(n_branch):
        v = v.at[0, c * slab:c * slab + To * Co].set(jnp.tile(b[c], To))
    return v


def _theta_matrix(theta1, To, in_rows, out_cols):
    """kron(I_To, Theta1) embedded in a 128-lane-padded matrix (zero rows/cols
    for the padded lanes)."""
    Co, Cs = theta1.shape
    m = jnp.zeros((in_rows, out_cols), jnp.float32)
    for t in range(To):
        m = m.at[t * Co:(t + 1) * Co, t * Cs:(t + 1) * Cs].set(theta1)
    return m


def stgcn_block_forward(x, a_hat, theta1, w1, b1, w2, b2, gamma, beta,
                        eps=1e-5):
    """x: (B, N, T, Cin) f32; returns (B, N, T-4, Cout) f32."""
    B, N, T, Cin = x.shape
    Cout, Csp = theta1.shape
    To1, To2 = T - 2, T - 4
    s1 = _pad128(To1 * Cout)      # conv1 branch slab width (lanes)
    s_mid = _pad128(To1 * Csp)    # theta output / conv2 input lanes
    s2 = _pad128(To2 * Cout)      # conv2 branch slab width (lanes)

    # Lane-dense 2D activation slab: rows = (batch, node), lanes = (time, chan).
    x2d = x.reshape(B * N, T * Cin)

    # Static operator packing; matmul weights stored as bf16 for the MXU
    # (f32 accumulation inside the kernel).
    bf16 = jnp.bfloat16
    w1big = _tconv_weight_matrix(w1, T, T * Cin, s1).astype(bf16)   # (T*Cin, 3*s1)
    b1big = _tconv_bias_vector(b1, To1, s1)                         # (1, 3*s1)
    thbig = _theta_matrix(theta1, To1, s1, s_mid).astype(bf16)      # (s1, s_mid)
    w2big = _tconv_weight_matrix(w2, To1, s_mid, s2).astype(bf16)   # (s_mid, 3*s2)
    b2big = _tconv_bias_vector(b2, To2, s2)                         # (1, 3*s2)
    gamma2 = gamma.reshape(N, 1).astype(jnp.float32)
    beta2 = beta.reshape(N, 1).astype(jnp.float32)
    a16 = a_hat.astype(bf16)

    operands = (x2d, a16, w1big, b1big, thbig, w2big, b2big, gamma2, beta2)

    # Advisory cost hint so XLA can schedule surrounding ops around the call.
    flops = 2 * B * N * (T * Cin * 3 * s1 + N * s1 + s1 * s_mid
                         + s_mid * 3 * s2)
    bytes_accessed = (sum(int(o.size) * o.dtype.itemsize for o in operands)
                      + B * N * s2 * x.dtype.itemsize)
    cost = pl.CostEstimate(flops=int(flops),
                           transcendentals=int(B * N * (s1 + s2) + N),
                           bytes_accessed=int(bytes_accessed))

    vmem = pl.BlockSpec(memory_space=pltpu.MemorySpace.VMEM)
    kernel = functools.partial(_stgcn_block_kernel, B=B, N=N,
                               valid_out_lanes=To2 * Cout, eps=eps)
    out2d = pl.pallas_call(
        kernel,
        out_shape=jax.ShapeDtypeStruct((B * N, s2), x.dtype),
        in_specs=[vmem] * len(operands),
        out_specs=vmem,
        cost_estimate=cost,
    )(*operands)
    # NOTE: at production sizes add a "parallel" grid (batch or node-tile rows;
    # BN stats are per-node so a node split needs no cross-core reduce), size
    # tiles against 64 MiB VMEM on v7x (vmem_limit_bytes), and stop
    # materializing the banded conv weights once T*Cin grows past ~512 lanes
    # (switch to 3 shifted matmuls accumulated in VMEM scratch).
    return out2d[:, :To2 * Cout].reshape(B, N, To2, Cout)


# ---------------------------------------------------------------------------
# Pure-JAX reference of the PyTorch forward (training-mode BN)
# ---------------------------------------------------------------------------
def _reference_forward(x, a_hat, theta1, w1, b1, w2, b2, gamma, beta, eps=1e-5):
    hi = jax.lax.Precision.HIGHEST

    def tconv(h, w, bias):
        To = h.shape[2] - 2

        def conv(c):
            out = bias[c][None, None, None, :]
            for k in range(3):
                out = out + jnp.einsum('bntc,cd->bntd', h[:, :, k:k + To, :],
                                       w[c, k], precision=hi)
            return out

        return jax.nn.relu(conv(0) * jax.nn.sigmoid(conv(1)) + conv(2))

    t = tconv(x, w1, b1)                                            # (B,N,T-2,Cout)
    lfs = jnp.einsum('ij,bjtc->bitc', a_hat, t, precision=hi)
    t2 = jax.nn.relu(jnp.einsum('bitc,cs->bits', lfs, theta1, precision=hi))
    t3 = tconv(t2, w2, b2)                                          # (B,N,T-4,Cout)
    mean = jnp.mean(t3, axis=(0, 2, 3), keepdims=True)
    var = jnp.mean((t3 - mean) ** 2, axis=(0, 2, 3), keepdims=True)
    xhat = (t3 - mean) * jax.lax.rsqrt(var + eps)
    return xhat * gamma[None, :, None, None] + beta[None, :, None, None]


if __name__ == "__main__":
    B, N, T = 2, 16, 8              # batch, num_nodes, num_timesteps
    Cin, Csp, Cout = 4, 8, 16       # in_channels, spatial_channels, out_channels

    key = jax.random.PRNGKey(0)
    ks = jax.random.split(key, 8)

    x = jax.random.normal(ks[0], (B, N, T, Cin), jnp.float32)

    # Deterministic normalized adjacency: A_hat = D^-1/2 (A + I) D^-1/2
    a = jax.random.uniform(ks[1], (N, N), jnp.float32)
    a = 0.5 * (a + a.T) + jnp.eye(N, dtype=jnp.float32)
    dinv = jax.lax.rsqrt(jnp.sum(a, axis=1))
    a_hat = dinv[:, None] * a * dinv[None, :]

    # Theta1 ~ U(-1/sqrt(spatial_channels), +) as in reset_parameters()
    stdv = 1.0 / (Csp ** 0.5)
    theta1 = jax.random.uniform(ks[2], (Cout, Csp), jnp.float32, -stdv, stdv)

    # TemporalConv params: 3 Conv2d(Ci, Co, kernel=(1,3)) per block, stored as
    # [which_conv, time_tap, Ci, Co] with W[c, k, ci, co] = torch_W[co, ci, 0, k].
    bd1 = 1.0 / ((Cin * 3) ** 0.5)
    w1 = jax.random.uniform(ks[3], (3, 3, Cin, Cout), jnp.float32, -bd1, bd1)
    b1 = jax.random.uniform(ks[4], (3, Cout), jnp.float32, -bd1, bd1)
    bd2 = 1.0 / ((Csp * 3) ** 0.5)
    w2 = jax.random.uniform(ks[5], (3, 3, Csp, Cout), jnp.float32, -bd2, bd2)
    b2 = jax.random.uniform(ks[6], (3, Cout), jnp.float32, -bd2, bd2)

    # BatchNorm2d default affine init
    gamma = jnp.ones((N,), jnp.float32)
    beta = jnp.zeros((N,), jnp.float32)

    out = jax.block_until_ready(
        stgcn_block_forward(x, a_hat, theta1, w1, b1, w2, b2, gamma, beta))
    assert out.shape == (B, N, T - 4, Cout), out.shape

    ref = jax.block_until_ready(
        _reference_forward(x, a_hat, theta1, w1, b1, w2, b2, gamma, beta))
    max_err = float(jnp.max(jnp.abs(out - ref)))
    # Tolerance note: the kernel feeds bf16 operands to the MXU (f32
    # accumulation, f32 elementwise) while the reference runs HIGHEST-precision
    # f32; BatchNorm's divide by the per-node std (~0.1 here) amplifies the
    # upstream bf16 rounding ~10x, so the elementwise bound is looser than an
    # all-f32 kernel would need.  Any structural/packing bug produces O(1)
    # errors and would still fail this check.
    assert jnp.allclose(out, ref, atol=5e-2, rtol=5e-2), f"max_err={max_err}"

    print("KERNEL_OK")
</pallas_src>

<mosaic_0001>
module attributes {stable_mosaic.version = 11 : i64} {
  func.func @_stgcn_block_kernel(%arg0: memref<32x32xf32, #tpu.memory_space<vmem>>, %arg1: memref<16x16xbf16, #tpu.memory_space<vmem>>, %arg2: memref<32x384xbf16, #tpu.memory_space<vmem>>, %arg3: memref<1x384xf32, #tpu.memory_space<vmem>>, %arg4: memref<128x128xbf16, #tpu.memory_space<vmem>>, %arg5: memref<128x384xbf16, #tpu.memory_space<vmem>>, %arg6: memref<1x384xf32, #tpu.memory_space<vmem>>, %arg7: memref<16x1xf32, #tpu.memory_space<vmem>>, %arg8: memref<16x1xf32, #tpu.memory_space<vmem>>, %arg9: memref<32x128xf32, #tpu.memory_space<vmem>>) attributes {dimension_semantics = [], scalar_prefetch = 0 : i64, scratch_operands = 0 : i64, tpu.core_type = #tpu.core_type<tc>} {
    %c0 = arith.constant 0 : index
    %c0_0 = arith.constant 0 : index
    %0 = vector.load %arg0[%c0, %c0_0] : memref<32x32xf32, #tpu.memory_space<vmem>>, vector<32x32xf32>
    %1 = arith.truncf %0 : vector<32x32xf32> to vector<32x32xbf16>
    %c0_1 = arith.constant 0 : index
    %c0_2 = arith.constant 0 : index
    %2 = vector.load %arg2[%c0_1, %c0_2] : memref<32x384xbf16, #tpu.memory_space<vmem>>, vector<32x384xbf16>
    %cst = arith.constant dense<0.000000e+00> : vector<32x384xf32>
    %3 = tpu.matmul %1, %2, %cst {dimension_numbers = #tpu.dot_dimension_numbers<[1], [0], [0], [1], [0, 0, 1, 1], [], []>} : vector<32x32xbf16>, vector<32x384xbf16>, vector<32x384xf32> -> vector<32x384xf32>
    %c0_3 = arith.constant 0 : index
    %c0_4 = arith.constant 0 : index
    %4 = vector.load %arg3[%c0_3, %c0_4] : memref<1x384xf32, #tpu.memory_space<vmem>>, vector<1x384xf32>
    %5 = vector.broadcast %4 : vector<1x384xf32> to vector<32x384xf32>
    %6 = arith.addf %3, %5 : vector<32x384xf32>
    %7 = vector.extract_strided_slice %6 {offsets = [0, 0], sizes = [32, 128], strides = [1, 1]} : vector<32x384xf32> to vector<32x128xf32>
    %8 = vector.extract_strided_slice %6 {offsets = [0, 128], sizes = [32, 128], strides = [1, 1]} : vector<32x384xf32> to vector<32x128xf32>
    %9 = vector.extract_strided_slice %6 {offsets = [0, 256], sizes = [32, 128], strides = [1, 1]} : vector<32x384xf32> to vector<32x128xf32>
    %10 = arith.negf %8 : vector<32x128xf32>
    %11 = math.exp %10 : vector<32x128xf32>
    %cst_5 = arith.constant 1.000000e+00 : f32
    %12 = vector.broadcast %cst_5 : f32 to vector<32x128xf32>
    %13 = arith.addf %12, %11 : vector<32x128xf32>
    %14 = arith.divf %12, %13 : vector<32x128xf32>
    %15 = arith.mulf %7, %14 : vector<32x128xf32>
    %16 = arith.addf %15, %9 : vector<32x128xf32>
    %cst_6 = arith.constant 0.000000e+00 : f32
    %17 = vector.broadcast %cst_6 : f32 to vector<32x128xf32>
    %18 = arith.maximumf %16, %17 : vector<32x128xf32>
    %19 = arith.truncf %18 : vector<32x128xf32> to vector<32x128xbf16>
    %c0_7 = arith.constant 0 : index
    %c0_8 = arith.constant 0 : index
    %20 = vector.load %arg1[%c0_7, %c0_8] : memref<16x16xbf16, #tpu.memory_space<vmem>>, vector<16x16xbf16>
    %21 = vector.extract_strided_slice %19 {offsets = [0, 0], sizes = [16, 128], strides = [1, 1]} : vector<32x128xbf16> to vector<16x128xbf16>
    %cst_9 = arith.constant dense<0.000000e+00> : vector<16x128xf32>
    %22 = tpu.matmul %20, %21, %cst_9 {dimension_numbers = #tpu.dot_dimension_numbers<[1], [0], [0], [1], [0, 0, 1, 1], [], []>} : vector<16x16xbf16>, vector<16x128xbf16>, vector<16x128xf32> -> vector<16x128xf32>
    %c0_10 = arith.constant 0 : index
    %c0_11 = arith.constant 0 : index
    %23 = vector.load %arg1[%c0_10, %c0_11] : memref<16x16xbf16, #tpu.memory_space<vmem>>, vector<16x16xbf16>
    %24 = vector.extract_strided_slice %19 {offsets = [16, 0], sizes = [16, 128], strides = [1, 1]} : vector<32x128xbf16> to vector<16x128xbf16>
    %cst_12 = arith.constant dense<0.000000e+00> : vector<16x128xf32>
    %25 = tpu.matmul %23, %24, %cst_12 {dimension_numbers = #tpu.dot_dimension_numbers<[1], [0], [0], [1], [0, 0, 1, 1], [], []>} : vector<16x16xbf16>, vector<16x128xbf16>, vector<16x128xf32> -> vector<16x128xf32>
    %26 = tpu.concatenate %22, %25 in 0 : vector<16x128xf32>, vector<16x128xf32> -> vector<32x128xf32>
    %27 = arith.truncf %26 : vector<32x128xf32> to vector<32x128xbf16>
    %c0_13 = arith.constant 0 : index
    %c0_14 = arith.constant 0 : index
    %28 = vector.load %arg4[%c0_13, %c0_14] : memref<128x128xbf16, #tpu.memory_space<vmem>>, vector<128x128xbf16>
    %cst_15 = arith.constant dense<0.000000e+00> : vector<32x128xf32>
    %29 = tpu.matmul %27, %28, %cst_15 {dimension_numbers = #tpu.dot_dimension_numbers<[1], [0], [0], [1], [0, 0, 1, 1], [], []>} : vector<32x128xbf16>, vector<128x128xbf16>, vector<32x128xf32> -> vector<32x128xf32>
    %cst_16 = arith.constant 0.000000e+00 : f32
    %30 = vector.broadcast %cst_16 : f32 to vector<32x128xf32>
    %31 = arith.maximumf %29, %30 : vector<32x128xf32>
    %32 = arith.truncf %31 : vector<32x128xf32> to vector<32x128xbf16>
    %c0_17 = arith.constant 0 : index
    %c0_18 = arith.constant 0 : index
    %33 = vector.load %arg5[%c0_17, %c0_18] : memref<128x384xbf16, #tpu.memory_space<vmem>>, vector<128x384xbf16>
    %cst_19 = arith.constant dense<0.000000e+00> : vector<32x384xf32>
    %34 = tpu.matmul %32, %33, %cst_19 {dimension_numbers = #tpu.dot_dimension_numbers<[1], [0], [0], [1], [0, 0, 1, 1], [], []>} : vector<32x128xbf16>, vector<128x384xbf16>, vector<32x384xf32> -> vector<32x384xf32>
    %c0_20 = arith.constant 0 : index
    %c0_21 = arith.constant 0 : index
    %35 = vector.load %arg6[%c0_20, %c0_21] : memref<1x384xf32, #tpu.memory_space<vmem>>, vector<1x384xf32>
    %36 = vector.broadcast %35 : vector<1x384xf32> to vector<32x384xf32>
    %37 = arith.addf %34, %36 : vector<32x384xf32>
    %38 = vector.extract_strided_slice %37 {offsets = [0, 0], sizes = [32, 128], strides = [1, 1]} : vector<32x384xf32> to vector<32x128xf32>
    %39 = vector.extract_strided_slice %37 {offsets = [0, 128], sizes = [32, 128], strides = [1, 1]} : vector<32x384xf32> to vector<32x128xf32>
    %40 = vector.extract_strided_slice %37 {offsets = [0, 256], sizes = [32, 128], strides = [1, 1]} : vector<32x384xf32> to vector<32x128xf32>
    %41 = arith.negf %39 : vector<32x128xf32>
    %42 = math.exp %41 : vector<32x128xf32>
    %cst_22 = arith.constant 1.000000e+00 : f32
    %43 = vector.broadcast %cst_22 : f32 to vector<32x128xf32>
    %44 = arith.addf %43, %42 : vector<32x128xf32>
    %45 = arith.divf %43, %44 : vector<32x128xf32>
    %46 = arith.mulf %38, %45 : vector<32x128xf32>
    %47 = arith.addf %46, %40 : vector<32x128xf32>
    %cst_23 = arith.constant 0.000000e+00 : f32
    %48 = vector.broadcast %cst_23 : f32 to vector<32x128xf32>
    %49 = arith.maximumf %47, %48 : vector<32x128xf32>
    %50 = vector.shape_cast %49 : vector<32x128xf32> to vector<2x16x128xf32>
    %51 = tpu.iota {dimensions = array<i32: 2>} : vector<1x1x128xi32>
    %c64_i32 = arith.constant 64 : i32
    %52 = vector.broadcast %c64_i32 : i32 to vector<1x1x128xi32>
    %53 = arith.cmpi slt, %51, %52 : vector<1x1x128xi32>
    %cst_24 = arith.constant dense<0.000000e+00> : vector<16x128xf32>
    %54 = vector.multi_reduction <add>, %50, %cst_24 [0] : vector<2x16x128xf32> to vector<16x128xf32>
    %cst_25 = arith.constant dense<0.000000e+00> : vector<16xf32>
    %55 = vector.multi_reduction <add>, %54, %cst_25 [1] : vector<16x128xf32> to vector<16xf32>
    %56 = vector.shape_cast %55 : vector<16xf32> to vector<16x1xf32>
    %cst_26 = arith.constant 7.812500e-03 : f32
    %57 = vector.broadcast %cst_26 : f32 to vector<16x1xf32>
    %58 = arith.mulf %56, %57 : vector<16x1xf32>
    %59 = vector.shape_cast %58 : vector<16x1xf32> to vector<1x16x1xf32>
    %60 = vector.broadcast %59 : vector<1x16x1xf32> to vector<2x16x128xf32>
    %61 = arith.subf %50, %60 : vector<2x16x128xf32>
    %cst_27 = arith.constant 0.000000e+00 : f32
    %62 = vector.shape_cast %53 : vector<1x1x128xi1> to vector<1x1x128xi1>
    %63 = vector.broadcast %62 : vector<1x1x128xi1> to vector<2x16x128xi1>
    %64 = vector.broadcast %cst_27 : f32 to vector<2x16x128xf32>
    %65 = arith.select %63, %61, %64 : vector<2x16x128xi1>, vector<2x16x128xf32>
    %66 = arith.mulf %65, %65 : vector<2x16x128xf32>
    %cst_28 = arith.constant dense<0.000000e+00> : vector<16x128xf32>
    %67 = vector.multi_reduction <add>, %66, %cst_28 [0] : vector<2x16x128xf32> to vector<16x128xf32>
    %cst_29 = arith.constant dense<0.000000e+00> : vector<16xf32>
    %68 = vector.multi_reduction <add>, %67, %cst_29 [1] : vector<16x128xf32> to vector<16xf32>
    %69 = vector.shape_cast %68 : vector<16xf32> to vector<16x1xf32>
    %cst_30 = arith.constant 7.812500e-03 : f32
    %70 = vector.broadcast %cst_30 : f32 to vector<16x1xf32>
    %71 = arith.mulf %69, %70 : vector<16x1xf32>
    %cst_31 = arith.constant 9.99999974E-6 : f32
    %72 = vector.broadcast %cst_31 : f32 to vector<16x1xf32>
    %73 = arith.addf %71, %72 : vector<16x1xf32>
    %74 = math.rsqrt %73 : vector<16x1xf32>
    %c0_32 = arith.constant 0 : index
    %c0_33 = arith.constant 0 : index
    %75 = vector.load %arg7[%c0_32, %c0_33] : memref<16x1xf32, #tpu.memory_space<vmem>>, vector<16x1xf32>
    %76 = arith.mulf %74, %75 : vector<16x1xf32>
    %c0_34 = arith.constant 0 : index
    %c0_35 = arith.constant 0 : index
    %77 = vector.load %arg8[%c0_34, %c0_35] : memref<16x1xf32, #tpu.memory_space<vmem>>, vector<16x1xf32>
    %78 = arith.mulf %58, %76 : vector<16x1xf32>
    %79 = arith.subf %77, %78 : vector<16x1xf32>
    %80 = vector.shape_cast %76 : vector<16x1xf32> to vector<1x16x1xf32>
    %81 = vector.broadcast %80 : vector<1x16x1xf32> to vector<2x16x128xf32>
    %82 = arith.mulf %50, %81 : vector<2x16x128xf32>
    %83 = vector.shape_cast %79 : vector<16x1xf32> to vector<1x16x1xf32>
    %84 = vector.broadcast %83 : vector<1x16x1xf32> to vector<2x16x128xf32>
    %85 = arith.addf %82, %84 : vector<2x16x128xf32>
    %86 = vector.shape_cast %85 : vector<2x16x128xf32> to vector<32x128xf32>
    %c0_36 = arith.constant 0 : index
    %c0_37 = arith.constant 0 : index
    %87 = vector.load %arg9[%c0_36, %c0_37] : memref<32x128xf32, #tpu.memory_space<vmem>>, vector<32x128xf32>
    tpu.vector_store %arg9[%c0_36, %c0_37], %86 {strides = array<i32>} : memref<32x128xf32, #tpu.memory_space<vmem>>, vector<32x128xf32>,
    return
  }
}

</mosaic_0001>

<bundles_post_ra>
// kernel: tpu_custom_call.1
= control target key start
LH: loop header
LB: loop body
LE: loop exit
PB: predicated region body
PF: predicated region fallthrough
CT: control target
= control target key end

     0   :  { %14 = vsyncpa [#allocation3], 0  ;;  %s1478_s0 = inlined_call_operand.vmem [shape: f32[32,32], index: 0, kind: input, shape index: {}]   ;;  %s1479_s1 = inlined_call_operand.hbm [shape: bf16[16,16], index: 1, kind: input, shape index: {}]   ;;  %s1480_s2 = inlined_call_operand.hbm [shape: bf16[32,384], index: 2, kind: input, shape index: {}]   ;;  %s1481_s3 = inlined_call_operand.vmem [shape: f32[1,384], index: 3, kind: input, shape index: {}]   ;;  %s1482_s4 = inlined_call_operand.hbm [shape: bf16[128,128], index: 4, kind: input, shape index: {}]   ;;  %s1483_s5 = inlined_call_operand.hbm [shape: bf16[128,384], index: 5, kind: input, shape index: {}]   ;;  %s1484_s6 = inlined_call_operand.vmem [shape: f32[1,384], index: 6, kind: input, shape index: {}]   ;;  %s1485_s7 = inlined_call_operand.vmem [shape: f32[16,1], index: 7, kind: input, shape index: {}]   ;;  %s1486_s8 = inlined_call_operand.vmem [shape: f32[16,1], index: 8, kind: input, shape index: {}]   ;;  %s1487_s9 = inlined_call_operand.hbm [shape: f32[32,128], index: 9, kind: output, shape index: {}]  }
   0x1   :  { %15 = vsyncpa [#allocation6], 0 }
   0x2   :  { %16 = vsyncpa [#allocation9], 0 }
   0x3   :  { %17 = vsyncpa [#allocation4], 0  ;;  %s1286_s30 = smov [#allocation5]   ;;  %s1168_s13 = scalar_lea.hbm %s1480_s2, 768 }
   0x4   :  { %s37_s10 = sshll.u32 %s1286_s30, 4  ;;  %p1169_p0 = scmp.ne.s32.totalorder %s1480_s2, %s1168_s13  ;;  %s38_s10 = int_to_ptr.vmem [resolvable:$true] %s37_s10 }
   0x5   :  { %p1172_p1 = scmp.lt.u32.totalorder %s1168_s13, %s1480_s2 }
   0x7   :  { %p1174_p2 = pnand %p1172_p1, %p1169_p0 }
   0x9   :  { %1177 = shalt.err (!%p1174_p2)
}
   0xa   :  { %s1178_s18 = scalar_lea.vmem %s38_s10, 768  ;;  %p1183_p4 = scmp.lt.s32.totalorder %s38_s10, %s38_s10 }
   0xb   :  { %p1179_p3 = scmp.ne.s32.totalorder %s38_s10, %s1178_s18  ;;  %p1184_p5 = scmp.lt.s32.totalorder %s1178_s18, %s1178_s18 }
   0xd   :  { %p1185_p6 = por %p1184_p5, %p1183_p4 }
   0xf   :  { %p1186_p7 = pnand %p1185_p6, %p1179_p3 }
  0x11   :  { %1189 = shalt.err (!%p1186_p7)
}
  0x12   :  { %s1287_s19 = smov 192   ;;  %s1288_s20 = smov 12  }
  0x13   :  { %43 = dma.hbm_to_vmem [thread:$0]  %s1480_s2, 768, %s38_s10, [#allocation6], %s1287_s19, %s1287_s19, %s1288_s20  }
  0x14   :  { %s1289_s23 = smov [#allocation2]   ;;  %s1190_s27 = scalar_lea.hbm %s1479_s1, 128 }
  0x15   :  { %s25_s24 = sshll.u32 %s1289_s23, 4  ;;  %p1191_p8 = scmp.ne.s32.totalorder %s1479_s1, %s1190_s27  ;;  %s26_s24 = int_to_ptr.vmem [resolvable:$true] %s25_s24 }
  0x16   :  { %p1194_p9 = scmp.lt.u32.totalorder %s1190_s27, %s1479_s1 }
  0x18   :  { %p1196_p10 = pnand %p1194_p9, %p1191_p8 }
  0x1a   :  { %1199 = shalt.err (!%p1196_p10)
}
  0x1b   :  { %s1200_s12 = scalar_lea.vmem %s26_s24, 128  ;;  %p1205_p12 = scmp.lt.s32.totalorder %s26_s24, %s26_s24 }
  0x1c   :  { %p1201_p11 = scmp.ne.s32.totalorder %s26_s24, %s1200_s12  ;;  %p1206_p13 = scmp.lt.s32.totalorder %s1200_s12, %s1200_s12 }
  0x1e   :  { %p1207_p0 = por %p1206_p13, %p1205_p12 }
  0x20   :  { %p1208_p1 = pnand %p1207_p0, %p1201_p11 }
  0x22   :  { %1211 = shalt.err (!%p1208_p1)
}
  0x23   :  { %s1290_s2 = smov 64   ;;  %s1291_s10 = smov 4  }
  0x24   :  { %31 = dma.hbm_to_vmem [thread:$0]  %s1479_s1, 128, %s26_s24, [#allocation3], %s1290_s2, %s1290_s2, %s1291_s10  }
  0x25   :  { %s1292_s15 = smov [#allocation7]   ;;  %s1293_s17 = smov [#allocation8]  }
  0x26   :  { %s51_s16 = sshll.u32 %s1292_s15, 4  ;;  %s63_s18 = sshll.u32 %s1293_s17, 4  ;;  %s52_s16 = int_to_ptr.vmem [resolvable:$true] %s51_s16  ;;  %s1377_s18 = int_to_ptr.vmem [resolvable:$true] %s63_s18 }
  0x27   :  { %s1212_s23 = scalar_lea.hbm %s1482_s4, 1024 }
  0x28   :  { %p1213_p2 = scmp.ne.s32.totalorder %s1482_s4, %s1212_s23  ;;  %p1216_p3 = scmp.lt.u32.totalorder %s1212_s23, %s1482_s4 }
  0x2a   :  { %p1218_p4 = pnand %p1216_p3, %p1213_p2 }
  0x2c   :  { %1221 = shalt.err (!%p1218_p4)
}
  0x2d   :  { %s1222_s1 = scalar_lea.vmem %s52_s16, 1024  ;;  %p1227_p6 = scmp.lt.s32.totalorder %s52_s16, %s52_s16 }
  0x2e   :  { %p1223_p5 = scmp.ne.s32.totalorder %s52_s16, %s1222_s1  ;;  %p1228_p7 = scmp.lt.s32.totalorder %s1222_s1, %s1222_s1 }
  0x30   :  { %p1229_p8 = por %p1228_p7, %p1227_p6 }
  0x32   :  { %p1230_p9 = pnand %p1229_p8, %p1223_p5 }
  0x34   :  { %1233 = shalt.err (!%p1230_p9)
}
  0x35   :  { %57 = dma.hbm_to_vmem [thread:$0]  %s1482_s4, 1024, %s52_s16, [#allocation6], %s1290_s2, %s1290_s2, %s1291_s10  }
  0x36   :  { %s1234_s12 = scalar_lea.hbm %s1483_s5, 3072 }
  0x37   :  { %p1235_p10 = scmp.ne.s32.totalorder %s1483_s5, %s1234_s12  ;;  %p1238_p11 = scmp.lt.u32.totalorder %s1234_s12, %s1483_s5 }
  0x39   :  { %p1240_p12 = pnand %p1238_p11, %p1235_p10 }
  0x3b   :  { %1243 = shalt.err (!%p1240_p12)
}
  0x3c   :  { %s1244_s21 = scalar_lea.vmem %s1377_s18, 3072  ;;  %p1249_p0 = scmp.lt.s32.totalorder %s1377_s18, %s1377_s18 }
  0x3d   :  { %p1245_p13 = scmp.ne.s32.totalorder %s1377_s18, %s1244_s21  ;;  %p1250_p1 = scmp.lt.s32.totalorder %s1244_s21, %s1244_s21 }
  0x3f   :  { %p1251_p2 = por %p1250_p1, %p1249_p0 }
  0x41   :  { %p1252_p3 = pnand %p1251_p2, %p1245_p13 }
  0x43   :  { %1255 = shalt.err (!%p1252_p3)
}
  0x44   :  { %69 = dma.hbm_to_vmem [thread:$0]  %s1483_s5, 3072, %s1377_s18, [#allocation9], %s1287_s19, %s1287_s19, %s1288_s20  }
  0x45   :  { %1278 = dma.done.wait [#allocation3], 128  }
  0x46   :  { %1279 = vsyncadd [#allocation3], 4294967168 }
  0x47   :  { %1280 = dma.done.wait [#allocation6], 1792  }
  0x48   :  { %1281 = vsyncadd [#allocation6], 4294965504 }
  0x49   :  { %1282 = dma.done.wait [#allocation9], 3072  }
  0x4a   :  { %1283 = vsyncadd [#allocation9], 4294964224  ;;  %v1294_v0 = vmov 0   ;;  %v1083_v1 = vld [vmem:[#allocation5 + $0x4] ss:$12 sps:$4 sm:$0xff]   ;;  %v89_v5 = vld [vmem:[%s1478_s0] sm:$0xff]  ;;  %v105_v14 = vlaneseq }
  0x4b   :  { %191 = vmatprep.mubr.bf16.mxu0 %v1294_v0  ;;  %1081 = vset.pattern.permute.xlu0 %v1294_v0  ;;  %v1085_v2 = vld [vmem:[#allocation5] ss:$12 sps:$4 sm:$0xff]   ;;  %v1086_v3 = vld [vmem:[#allocation5 + $0x1c] ss:$12 sps:$4 sm:$0xff]   ;;  %v1088_v4 = vld [vmem:[#allocation5 + $0x18] ss:$12 sps:$4 sm:$0xff]  }
  0x4c   :  { %1082 = vset.pattern.permute.xlu1 %v1294_v0  ;;  %159 = vmatprep.subr.bf16.mxu0 %v1083_v1  ;;  %v90_v6 = vld [vmem:[%s1478_s0 + $0x8] sm:$0xff]  ;;  %v1089_v7 = vld [vmem:[#allocation5 + $0x8] ss:$12 sps:$4 sm:$0xff]   ;;  %vm152_vm0 = vcmask 261120   ;;  %v1295_v13 = vmov 0.0   ;;  %vm1296_vm1 = vmmov 0  }
  0x4d   :  { %160 = vmatpush1.bf16.msra.mxu0 %v1085_v2  ;;  %v93_v8 = vpack.c.bf16 %v90_v6, %v89_v5  ;;  %v1090_v9 = vld [vmem:[#allocation5 + $0x20] ss:$12 sps:$4 sm:$0xff]   ;;  %v92_v11 = vld [vmem:[%s1478_s0 + $0x18] sm:$0xff]  ;;  %1015 = vmatprep.subr.bf16.mxu1 %v1295_v13  ;;  %v1428_v15 = vshrl.u32 %v105_v14, 7  ;;  %v103_v17 = vld [vmem:[%s1481_s3] sm:$0x7] }
  0x4e   :  { %161 = vmatprep.subr.bf16.mxu0 %v1086_v3  ;;  %v91_v10 = vld [vmem:[%s1478_s0 + $0x10] sm:$0xff]  ;;  %1017 = vmatprep.mubr.msk.bf16.mxu1 %vm1296_vm1, %v1295_v13  ;;  %v1092_v2 = vld [vmem:[#allocation7] sm:$0xff]   ;;  %vm306_vm2 = vcmask 130048  }
  0x4f   :  { %v94_v12 = vpack.c.bf16 %v92_v11, %v91_v10  ;;  %v111_v16 = vsub.s32 1, %v1428_v15  ;;  %v107_v43 = vsub.s32 0, %v1428_v15  ;;  %v115_v44 = vsub.s32 2, %v1428_v15 }
  0x51   :  { %162 = vmatpush1.bf16.msra.mxu0 %v1088_v4  ;;  %v112_v18 = vrot.slane %v103_v17, %v111_v16  ;;  %v108_v46 = vrot.slane %v103_v17, %v107_v43  ;;  %v116_v47 = vrot.slane %v103_v17, %v115_v44 }
  0x52   :  { %1007 = vmatprep.subr.bf16.mxu0 %v1089_v7 }
  0x54   :  { %932 = vmatmul.mubr.msk.bf16.vlgmr.msra.gmra.mrb[0].mxu0 %vm152_vm0, %v93_v8 }
  0x55   :  { %201 = vmatprep.mubr.bf16.mxu0 %v1294_v0  ;;  %1008 = vmatpush3.bf16.msra.mxu0 %v1089_v7 }
  0x56   :  { %1009 = vmatprep.subr.bf16.mxu0 %v1090_v9 }
  0x59   :  { %1010 = vmatpush3.bf16.msra.mxu0 %v1090_v9 }
  0x5a   :  { %1021 = vmatprep.subr.bf16.mxu0 %v1295_v13 }
  0x5c   :  { %933 = vmatmul.mubr.msk.bf16.gmra.mrb[4].mxu0 %vm152_vm0, %v94_v12 }
  0x5d   :  { %1011 = vmatprep.mubr.msk.bf16.mxu0 %vm152_vm0, %v93_v8  ;;  %v1091_v8 = vld [vmem:[#allocation2] sm:$0xff]  }
  0x64   :  { %1012 = vmatmul.mubr.msk.bf16.vlgmr.msra.gmra.mrb[8].mxu0 %vm152_vm0, %v94_v12  ;;  %v1093_v12 = vld [vmem:[#allocation7 + $0x8] sm:$0xff]  }
  0x65   :  { %1023 = vmatprep.mubr.msk.bf16.mxu0 %vm1296_vm1, %v1295_v13 }
 0x127   :  { %v193_v19 = vpop.f32.mrb[0].mxu0 }
 0x128   :  { %v195_v20 = vpop.f32.mrb[1].mxu0  ;;  %v194_v51 = vadd.f32 %v193_v19, %v108_v46  ;;  %v1094_v19 = vld [vmem:[#allocation7 + $0x10] sm:$0xff]  }
 0x129   :  { %v196_v21 = vadd.f32 %v195_v20, %v112_v18  ;;  %v197_v22 = vpop.f32.mrb[2].mxu0 }
 0x12a   :  { %v199_v23 = vpop.f32.mrb[3].mxu0  ;;  %v198_v54 = vadd.f32 %v197_v22, %v108_v46  ;;  %v1096_v22 = vld [vmem:[#allocation7 + $0x20] sm:$0xff]  }
 0x12b   :  { %v936_v24 = vmul.f32 -1.442695, %v196_v21  ;;  %v200_v25 = vadd.f32 %v199_v23, %v112_v18  ;;  %v1095_v21 = vld [vmem:[#allocation7 + $0x18] sm:$0xff]   ;;  %v1097_v23 = vld [vmem:[#allocation7 + $0x28] sm:$0xff]  }
 0x12d   :  { %1132 = vpow2.f32 %v936_v24  ;;  %v937_v26 = vmul.f32 -1.442695, %v200_v25  ;;  %v1098_v24 = vld [vmem:[#allocation7 + $0x30] sm:$0xff]   ;;  %v1099_v25 = vld [vmem:[#allocation7 + $0x38] sm:$0xff]  }
 0x12f   :  { %1134 = vpow2.f32 %v937_v26  ;;  %v203_v27 = vpop.f32.mrb[4].mxu0  ;;  %v1100_v26 = vld [vmem:[#allocation8] ss:$12 sps:$4 sm:$0xff]  }
 0x130   :  { %v205_v28 = vpop.f32.mrb[5].mxu0  ;;  %v204_v61 = vadd.f32 %v203_v27, %v108_v46  ;;  %v1102_v27 = vld [vmem:[#allocation8 + $0x4] ss:$12 sps:$4 sm:$0xff]  }
 0x131   :  { %v206_v29 = vadd.f32 %v205_v28, %v112_v18  ;;  %v207_v30 = vpop.f32.mrb[6].mxu0  ;;  %v1103_v28 = vld [vmem:[#allocation8 + $0x8] ss:$12 sps:$4 sm:$0xff]  }
 0x132   :  { %v209_v31 = vpop.f32.mrb[7].mxu0  ;;  %v208_v3 = vadd.f32 %v207_v30, %v108_v46  ;;  %v1104_v30 = vld [vmem:[#allocation8 + $0x18] ss:$12 sps:$4 sm:$0xff]  }
 0x133   :  { %v938_v32 = vmul.f32 -1.442695, %v206_v29  ;;  %v210_v33 = vadd.f32 %v209_v31, %v112_v18  ;;  %v1106_v29 = vld [vmem:[#allocation8 + $0x1c] ss:$12 sps:$4 sm:$0xff]   ;;  %v1110_v31 = vld [vmem:[#allocation8 + $0x34] ss:$12 sps:$4 sm:$0xff]  }
 0x135   :  { %1136 = vpow2.f32 %v938_v32  ;;  %v939_v34 = vmul.f32 -1.442695, %v210_v33  ;;  %v1108_v32 = vld [vmem:[#allocation8 + $0x30] ss:$12 sps:$4 sm:$0xff]   ;;  %v1114_v33 = vld [vmem:[#allocation8 + $0x4c] ss:$12 sps:$4 sm:$0xff]  }
 0x137   :  { %v1133_v35 = vpop.eup %1132  ;;  %1138 = vpow2.f32 %v939_v34  ;;  %v1013_v36 = vpop.f32.mrb[8].mxu0  ;;  %v1112_v34 = vld [vmem:[#allocation8 + $0x48] ss:$12 sps:$4 sm:$0xff]  }
 0x138   :  { %v273_v37 = vadd.f32 1.0, %v1133_v35  ;;  %v246_v38 = vpop.f32.mrb[9].mxu0  ;;  %v255_v4 = vadd.f32 %v1013_v36, %v116_v47  ;;  %v1118_v35 = vld [vmem:[#allocation8 + $0x64] ss:$12 sps:$4 sm:$0xff]   ;;  %v1116_v36 = vld [vmem:[#allocation8 + $0x60] ss:$12 sps:$4 sm:$0xff]  }
 0x139   :  { %v1135_v39 = vpop.eup %1134  ;;  %v1014_v40 = vpop.f32.mrb[10].mxu0  ;;  %v247_v52 = vadd.f32 %v246_v38, %v116_v47  ;;  %v1120_v38 = vld [vmem:[#allocation8 + $0x78] ss:$12 sps:$4 sm:$0xff]  }
 0x13a   :  { %1140 = vrcp.f32 %v273_v37  ;;  %v274_v41 = vadd.f32 1.0, %v1135_v39  ;;  %v249_v42 = vpop.f32.mrb[11].mxu0  ;;  %v258_v10 = vadd.f32 %v1014_v40, %v116_v47  ;;  %v1122_v37 = vld [vmem:[#allocation8 + $0x7c] ss:$12 sps:$4 sm:$0xff]  }
 0x13b   :  { %v250_v56 = vadd.f32 %v249_v42, %v116_v47 }
 0x13c   :  { %1142 = vrcp.f32 %v274_v41 }
 0x13f   :  { %v1137_v45 = vpop.eup %1136 }
 0x140   :  { %v275_v48 = vadd.f32 1.0, %v1137_v45 }
 0x141   :  { %v1139_v49 = vpop.eup %1138 }
 0x142   :  { %1144 = vrcp.f32 %v275_v48  ;;  %v276_v50 = vadd.f32 1.0, %v1139_v49 }
 0x144   :  { %v1141_v53 = vpop.eup %1140  ;;  %1146 = vrcp.f32 %v276_v50 }
 0x145   :  { %v285_v55 = vmul.f32 %v1141_v53, %v194_v51  ;;  %v1107_v51 = vld [vmem:[#allocation8 + $0x20] ss:$12 sps:$4 sm:$0xff]   ;;  %v1115_v53 = vld [vmem:[#allocation8 + $0x50] ss:$12 sps:$4 sm:$0xff]  }
 0x146   :  { %v1143_v57 = vpop.eup %1142 }
 0x147   :  { %v289_v58 = vadd.f32 %v285_v55, %v247_v52  ;;  %v286_v59 = vmul.f32 %v1143_v57, %v198_v54  ;;  %v1111_v52 = vld [vmem:[#allocation8 + $0x38] ss:$12 sps:$4 sm:$0xff]   ;;  %v1119_v54 = vld [vmem:[#allocation8 + $0x68] ss:$12 sps:$4 sm:$0xff]   ;;  %v1123_v55 = vld [vmem:[#allocation8 + $0x80] ss:$12 sps:$4 sm:$0xff]  }
 0x148   :  { %v1124_v57 = vld [vmem:[#allocation8 + $0x90] ss:$12 sps:$4 sm:$0xff]  }
 0x149   :  { %v290_v60 = vadd.f32 %v286_v59, %v250_v56  ;;  %v293_v62 = vmax.f32 %v289_v58, 0.0  ;;  %v1126_v56 = vld [vmem:[#allocation8 + $0x94] ss:$12 sps:$4 sm:$0xff]   ;;  %v1127_v58 = vld [vmem:[#allocation8 + $0x98] ss:$12 sps:$4 sm:$0xff]  }
 0x14a   :  { %v1130_v59 = vld [vmem:[#allocation8 + $0xac] ss:$12 sps:$4 sm:$0xff]  }
 0x14b   :  { %v294_v63 = vmax.f32 %v290_v60, 0.0  ;;  %v1128_v60 = vld [vmem:[#allocation8 + $0xa8] ss:$12 sps:$4 sm:$0xff]  }
 0x14c   :  { %v1145_v1 = vpop.eup %1144 }
 0x14d   :  { %v287_v5 = vmul.f32 %v1145_v1, %v204_v61  ;;  %v297_v6 = vpack.c.bf16 %v294_v63, %v293_v62  ;;  %v1131_v61 = vld [vmem:[#allocation8 + $0xb0] ss:$12 sps:$4 sm:$0xff]  }
 0x14e   :  { %v1147_v7 = vpop.eup %1146 }
 0x14f   :  { %v291_v9 = vadd.f32 %v287_v5, %v255_v4  ;;  %v288_v11 = vmul.f32 %v1147_v7, %v208_v3  ;;  %1016 = vmatpush3.bf16.msra.mxu1 %v297_v6 }
 0x150   :  { %1027 = vmatprep.subr.bf16.mxu1 %v1092_v2 }
 0x151   :  { %v292_v13 = vadd.f32 %v288_v11, %v258_v10  ;;  %v295_v17 = vmax.f32 %v291_v9, 0.0  ;;  %v545_v9 = vld [vmem:[%s1484_s6] sm:$0x7] }
 0x152   :  { %1018 = vmatmul.mubr.msk.bf16.vlgmr.msra.gmra.mrb[0].mxu1 %vm306_vm2, %v1091_v8  ;;  %v554_v10 = vrot.slane %v545_v9, %v111_v16 }
 0x153   :  { %v296_v18 = vmax.f32 %v292_v13, 0.0  ;;  %1028 = vmatpush3.bf16.msra.mxu1 %v1092_v2 }
 0x154   :  { %1029 = vmatprep.subr.bf16.mxu1 %v1093_v12 }
 0x155   :  { %v298_v20 = vpack.c.bf16 %v296_v18, %v295_v17 }
 0x157   :  { %1022 = vmatpush3.bf16.msra.mxu0 %v298_v20  ;;  %1030 = vmatpush3.bf16.msra.mxu1 %v1093_v12 }
 0x158   :  { %1031 = vmatprep.subr.bf16.mxu1 %v1094_v19  ;;  %690 = vmatprep.subr.bf16.mxu0 %v1102_v27 }
 0x15a   :  { %1024 = vmatmul.mubr.msk.bf16.vlgmr.msra.gmra.mrb[12].mxu0 %vm306_vm2, %v1091_v8 }
 0x15b   :  { %1032 = vmatpush3.bf16.msra.mxu1 %v1094_v19  ;;  %722 = vmatprep.mubr.bf16.mxu0 %v1294_v0 }
 0x15c   :  { %1033 = vmatprep.subr.bf16.mxu1 %v1095_v21  ;;  %691 = vmatpush1.bf16.msra.mxu0 %v1100_v26 }
 0x15d   :  { %692 = vmatprep.subr.bf16.mxu0 %v1106_v29 }
 0x15f   :  { %1034 = vmatpush3.bf16.msra.mxu1 %v1095_v21 }
 0x160   :  { %1035 = vmatprep.subr.bf16.mxu1 %v1096_v22  ;;  %693 = vmatpush1.bf16.msra.mxu0 %v1104_v30 }
 0x161   :  { %694 = vmatprep.subr.bf16.mxu0 %v1110_v31 }
 0x163   :  { %1036 = vmatpush3.bf16.msra.mxu1 %v1096_v22 }
 0x164   :  { %1037 = vmatprep.subr.bf16.mxu1 %v1097_v23  ;;  %695 = vmatpush1.bf16.msra.mxu0 %v1108_v32 }
 0x165   :  { %696 = vmatprep.subr.bf16.mxu0 %v1114_v33 }
 0x167   :  { %1038 = vmatpush3.bf16.msra.mxu1 %v1097_v23 }
 0x168   :  { %1039 = vmatprep.subr.bf16.mxu1 %v1098_v24  ;;  %697 = vmatpush1.bf16.msra.mxu0 %v1112_v34 }
 0x169   :  { %698 = vmatprep.subr.bf16.mxu0 %v1118_v35 }
 0x16b   :  { %1040 = vmatpush3.bf16.msra.mxu1 %v1098_v24 }
 0x16c   :  { %1041 = vmatprep.subr.bf16.mxu1 %v1099_v25  ;;  %699 = vmatpush1.bf16.msra.mxu0 %v1116_v36 }
 0x16d   :  { %700 = vmatprep.subr.bf16.mxu0 %v1122_v37  ;;  %v550_v37 = vrot.slane %v545_v9, %v107_v43 }
 0x16f   :  { %1042 = vmatpush3.bf16.msra.mxu1 %v1099_v25 }
 0x170   :  { %1047 = vmatprep.subr.bf16.mxu1 %v1103_v28  ;;  %701 = vmatpush1.bf16.msra.mxu0 %v1120_v38 }
 0x171   :  { %702 = vmatprep.subr.bf16.mxu0 %v1126_v56 }
 0x174   :  { %703 = vmatpush1.bf16.msra.mxu0 %v1124_v57 }
 0x175   :  { %704 = vmatprep.subr.bf16.mxu0 %v1130_v59 }
 0x178   :  { %705 = vmatpush1.bf16.msra.mxu0 %v1128_v60 }
 0x225   :  { %v344_v39 = vpop.f32.mrb[0].mxu1 }
 0x226   :  { %v1019_v40 = vpop.f32.mrb[1].mxu1 }
 0x227   :  { %v347_v41 = vpop.f32.mrb[2].mxu1  ;;  %v558_v40 = vrot.slane %v545_v9, %v115_v44 }
 0x228   :  { %v392_v42 = vpack.c.bf16 %v347_v41, %v344_v39  ;;  %v1020_v45 = vpop.f32.mrb[3].mxu1 }
 0x22a   :  { %1043 = vmatprep.mubr.bf16.mxu1 %v392_v42 }
 0x22d   :  { %v385_v46 = vpop.f32.mrb[12].mxu0 }
 0x22e   :  { %v1025_v47 = vpop.f32.mrb[13].mxu0 }
 0x22f   :  { %v388_v48 = vpop.f32.mrb[14].mxu0 }
 0x230   :  { %v393_v49 = vpack.c.bf16 %v388_v48, %v385_v46  ;;  %v1026_v50 = vpop.f32.mrb[15].mxu0 }
 0x232   :  { %1044 = vmatmul.mubr.bf16.vlgmr.msra.gmra.mrb[4].mxu1 %v393_v49 }
 0x233   :  { %1048 = vmatpush3.bf16.msra.mxu1 %v1103_v28 }
 0x234   :  { %1049 = vmatprep.subr.bf16.mxu1 %v1107_v51 }
 0x237   :  { %1050 = vmatpush3.bf16.msra.mxu1 %v1107_v51 }
 0x238   :  { %1051 = vmatprep.subr.bf16.mxu1 %v1111_v52 }
 0x23b   :  { %1052 = vmatpush3.bf16.msra.mxu1 %v1111_v52 }
 0x23c   :  { %1053 = vmatprep.subr.bf16.mxu1 %v1115_v53 }
 0x23f   :  { %1054 = vmatpush3.bf16.msra.mxu1 %v1115_v53 }
 0x240   :  { %1055 = vmatprep.subr.bf16.mxu1 %v1119_v54 }
 0x243   :  { %1056 = vmatpush3.bf16.msra.mxu1 %v1119_v54 }
 0x244   :  { %1057 = vmatprep.subr.bf16.mxu1 %v1123_v55 }
 0x247   :  { %1058 = vmatpush3.bf16.msra.mxu1 %v1123_v55 }
 0x248   :  { %1059 = vmatprep.subr.bf16.mxu1 %v1127_v58 }
 0x24b   :  { %1060 = vmatpush3.bf16.msra.mxu1 %v1127_v58 }
 0x24c   :  { %1061 = vmatprep.subr.bf16.mxu1 %v1131_v61 }
 0x24f   :  { %1062 = vmatpush3.bf16.msra.mxu1 %v1131_v61 }
 0x305   :  { %v1045_v62 = vpop.f32.mrb[4].mxu1 }
 0x306   :  { %v492_v63 = vpop.f32.mrb[5].mxu1  ;;  %v509_v2 = vmax.f32 %v1045_v62, 0.0 }
 0x307   :  { %v1046_v1 = vpop.f32.mrb[6].mxu1  ;;  %v507_v5 = vmax.f32 %v492_v63, 0.0 }
 0x308   :  { %v510_v3 = vmax.f32 %v1046_v1, 0.0  ;;  %v495_v4 = vpop.f32.mrb[7].mxu1 }
 0x309   :  { %v508_v6 = vmax.f32 %v495_v4, 0.0  ;;  %v829_v4 = vand.u32 127, %v105_v14 }
 0x30a   :  { %v512_v7 = vpack.c.bf16 %v510_v3, %v509_v2 }
 0x30b   :  { %v511_v8 = vpack.c.bf16 %v508_v6, %v507_v5  ;;  %vm830_vm3 = vcmp.lt.s32.totalorder %v829_v4, 64 }
 0x30d   :  { %723 = vmatmul.mubr.bf16.vlgmr.msra.gmra.mrb[16].mxu0 %v511_v8  ;;  %1063 = vmatprep.mubr.bf16.mxu1 %v511_v8 }
 0x30e   :  { %1064 = vmatmul.mubr.bf16.vlgmr.msra.gmra.mrb[8].mxu1 %v512_v7  ;;  %732 = vmatprep.mubr.bf16.mxu0 %v1294_v0 }
 0x315   :  { %733 = vmatmul.mubr.bf16.gmra.mrb[20].mxu0 %v512_v7 }
 0x3e0   :  { %v724_v11 = vpop.f32.mrb[16].mxu0 }
 0x3e1   :  { %v726_v12 = vpop.f32.mrb[17].mxu0  ;;  %v1065_v13 = vpop.f32.mrb[8].mxu1  ;;  %v725_v42 = vadd.f32 %v724_v11, %v550_v37 }
 0x3e2   :  { %v727_v17 = vadd.f32 %v726_v12, %v554_v10  ;;  %v728_v18 = vpop.f32.mrb[18].mxu0  ;;  %v777_v19 = vpop.f32.mrb[9].mxu1  ;;  %v786_v55 = vadd.f32 %v1065_v13, %v558_v40 }
 0x3e3   :  { %v730_v20 = vpop.f32.mrb[19].mxu0  ;;  %v1066_v21 = vpop.f32.mrb[10].mxu1  ;;  %v729_v46 = vadd.f32 %v728_v18, %v550_v37  ;;  %v778_v47 = vadd.f32 %v777_v19, %v558_v40 }
 0x3e4   :  { %v975_v22 = vmul.f32 -1.442695, %v727_v17  ;;  %v731_v23 = vadd.f32 %v730_v20, %v554_v10  ;;  %v780_v24 = vpop.f32.mrb[11].mxu1  ;;  %v789_v44 = vadd.f32 %v1066_v21, %v558_v40 }
 0x3e5   :  { %v781_v51 = vadd.f32 %v780_v24, %v558_v40 }
 0x3e6   :  { %1148 = vpow2.f32 %v975_v22  ;;  %v976_v0 = vmul.f32 -1.442695, %v731_v23 }
 0x3e8   :  { %1150 = vpow2.f32 %v976_v0  ;;  %v734_v25 = vpop.f32.mrb[20].mxu0 }
 0x3e9   :  { %v736_v26 = vpop.f32.mrb[21].mxu0  ;;  %v735_v54 = vadd.f32 %v734_v25, %v550_v37 }
 0x3ea   :  { %v737_v27 = vadd.f32 %v736_v26, %v554_v10  ;;  %v738_v28 = vpop.f32.mrb[22].mxu0 }
 0x3eb   :  { %v740_v29 = vpop.f32.mrb[23].mxu0  ;;  %v739_v56 = vadd.f32 %v738_v28, %v550_v37 }
 0x3ec   :  { %v977_v16 = vmul.f32 -1.442695, %v737_v27  ;;  %v741_v30 = vadd.f32 %v740_v29, %v554_v10 }
 0x3ee   :  { %1152 = vpow2.f32 %v977_v16  ;;  %v978_v31 = vmul.f32 -1.442695, %v741_v30  ;;  %v865_v16 = vld [vmem:[%s1485_s7] sm:$0xff] }
 0x3f0   :  { %v1149_v32 = vpop.eup %1148  ;;  %1154 = vpow2.f32 %v978_v31 }
 0x3f1   :  { %v804_v33 = vadd.f32 1.0, %v1149_v32  ;;  %v866_v32 = vld [vmem:[%s1485_s7 + $0x8] sm:$0xff]  ;;  %s1297_s7 = smov [#allocation10]  }
 0x3f2   :  { %v1151_v34 = vpop.eup %1150  ;;  %s912_s12 = sshll.u32 %s1297_s7, 4  ;;  %s913_s12 = int_to_ptr.vmem [resolvable:$true] %s912_s12 }
 0x3f3   :  { %1156 = vrcp.f32 %v804_v33  ;;  %v805_v35 = vadd.f32 1.0, %v1151_v34  ;;  %p1261_p5 = scmp.lt.s32.totalorder %s913_s12, %s913_s12 }
 0x3f5   :  { %1158 = vrcp.f32 %v805_v35 }
 0x3f8   :  { %v1153_v36 = vpop.eup %1152 }
 0x3f9   :  { %v806_v38 = vadd.f32 1.0, %v1153_v36  ;;  %v869_v36 = vld [vmem:[%s1486_s8] sm:$0xff] }
 0x3fa   :  { %v1155_v39 = vpop.eup %1154 }
 0x3fb   :  { %1160 = vrcp.f32 %v806_v38  ;;  %v807_v41 = vadd.f32 1.0, %v1155_v39  ;;  %v870_v39 = vld [vmem:[%s1486_s8 + $0x8] sm:$0xff]  ;;  %s1256_s8 = scalar_lea.vmem %s913_s12, 512 }
 0x3fc   :  { %p1257_p4 = scmp.ne.s32.totalorder %s913_s12, %s1256_s8  ;;  %p1262_p6 = scmp.lt.s32.totalorder %s1256_s8, %s1256_s8 }
 0x3fd   :  { %v1157_v45 = vpop.eup %1156  ;;  %1162 = vrcp.f32 %v807_v41 }
 0x3fe   :  { %v816_v48 = vmul.f32 %v1157_v45, %v725_v42  ;;  %p1263_p7 = por %p1262_p6, %p1261_p5 }
 0x3ff   :  { %v1159_v49 = vpop.eup %1158 }
 0x400   :  { %v820_v50 = vadd.f32 %v816_v48, %v778_v47  ;;  %v817_v52 = vmul.f32 %v1159_v49, %v729_v46  ;;  %p1264_p8 = pnand %p1263_p7, %p1257_p4 }
 0x402   :  { %v821_v53 = vadd.f32 %v817_v52, %v781_v51  ;;  %v824_v60 = vmax.f32 %v820_v50, 0.0 }
 0x404   :  { %v825_v2 = vmax.f32 %v821_v53, 0.0 }
 0x405   :  { %v1161_v43 = vpop.eup %1160 }
 0x406   :  { %v818_v57 = vmul.f32 %v1161_v43, %v735_v54 }
 0x407   :  { %v1163_v15 = vpop.eup %1162 }
 0x408   :  { %v822_v58 = vadd.f32 %v818_v57, %v786_v55  ;;  %v819_v59 = vmul.f32 %v1163_v15, %v739_v56 }
 0x40a   :  { %v826_v61 = vmax.f32 %v822_v58, 0.0  ;;  %v823_v62 = vadd.f32 %v819_v59, %v789_v44 }
 0x40c   :  { %v831_v63 = vadd.f32 %v826_v61, %v824_v60  ;;  %v827_v1 = vmax.f32 %v823_v62, 0.0 }
 0x40e   :  { %833 = vadd.xlane.f32.xlu0 %v831_v63  ;;  %v832_v3 = vadd.f32 %v827_v1, %v825_v2 }
 0x412   :  { %835 = vadd.xlane.f32.xlu0 %v832_v3 }
 0x49b   :  { %v834_v5 = vpop.xlane.xlu0 %833 }
 0x49c   :  { %v837_v6 = vmul.f32 0.0078125, %v834_v5 }
 0x49e   :  { %v839_v7 = vsub.f32 %v824_v60, %v837_v6  ;;  %v841_v8 = vsub.f32 %v826_v61, %v837_v6 }
 0x49f   :  { %v836_v9 = vpop.xlane.xlu0 %835 }
 0x4a0   :  { %v838_v10 = vmul.f32 0.0078125, %v836_v9  ;;  %v845_v11 = vsel %vm830_vm3, %v839_v7, 0.0  ;;  %v847_v12 = vsel %vm830_vm3, %v841_v8, 0.0 }
 0x4a1   :  { %v849_v13 = vmul.f32 %v845_v11, %v845_v11  ;;  %v851_v17 = vmul.f32 %v847_v12, %v847_v12 }
 0x4a2   :  { %v840_v18 = vsub.f32 %v825_v2, %v838_v10  ;;  %v842_v19 = vsub.f32 %v827_v1, %v838_v10 }
 0x4a3   :  { %v853_v20 = vadd.f32 %v851_v17, %v849_v13 }
 0x4a4   :  { %v846_v21 = vsel %vm830_vm3, %v840_v18, 0.0  ;;  %v848_v22 = vsel %vm830_vm3, %v842_v19, 0.0 }
 0x4a5   :  { %855 = vadd.xlane.f32.xlu1 %v853_v20  ;;  %v850_v23 = vmul.f32 %v846_v21, %v846_v21  ;;  %v852_v24 = vmul.f32 %v848_v22, %v848_v22 }
 0x4a7   :  { %v854_v14 = vadd.f32 %v852_v24, %v850_v23 }
 0x4a9   :  { %857 = vadd.xlane.f32.xlu1 %v854_v14 }
 0x532   :  { %v856_v0 = vpop.xlane.xlu1 %855 }
 0x533   :  { %v859_v25 = vmul.f32 0.0078125, %v856_v0 }
 0x535   :  { %v861_v26 = vadd.f32 1e-05, %v859_v25 }
 0x536   :  { %v858_v27 = vpop.xlane.xlu1 %857 }
 0x537   :  { %1164 = vrsqrt.f32 %v861_v26  ;;  %v860_v28 = vmul.f32 0.0078125, %v858_v27 }
 0x539   :  { %v862_v29 = vadd.f32 1e-05, %v860_v28 }
 0x53b   :  { %1166 = vrsqrt.f32 %v862_v29 }
 0x541   :  { %v1165_v30 = vpop.eup %1164 }
 0x542   :  { %v867_v31 = vmul.f32 %v1165_v30, %v865_v16 }
 0x544   :  { %877 = vperm.xlu0 %1081, %v867_v31   ;;  %v871_v35 = vmul.f32 %v867_v31, %v837_v6 }
 0x545   :  { %v1167_v33 = vpop.eup %1166 }
 0x546   :  { %v868_v34 = vmul.f32 %v1167_v33, %v866_v32  ;;  %v873_v37 = vsub.f32 %v869_v36, %v871_v35 }
 0x548   :  { %882 = vperm.xlu1 %1082, %v868_v34   ;;  %v872_v38 = vmul.f32 %v868_v34, %v838_v10 }
 0x54a   :  { %v874_v40 = vsub.f32 %v870_v39, %v872_v38 }
 0x54c   :  { %891 = vperm.xlu1 %1082, %v873_v37  }
 0x550   :  { %896 = vperm.xlu1 %1082, %v874_v40  }
 0x5c3   :  { %v878_v41 = vpop.permute.xlu0 %877 }
 0x5c4   :  { %v885_v45 = vmul.f32 %v878_v41, %v824_v60  ;;  %v887_v46 = vmul.f32 %v878_v41, %v826_v61 }
 0x5c7   :  { %v883_v42 = vpop.permute.xlu1 %882 }
 0x5c8   :  { %v886_v50 = vmul.f32 %v883_v42, %v825_v2  ;;  %v888_v51 = vmul.f32 %v883_v42, %v827_v1 }
 0x5cb   :  { %v892_v47 = vpop.permute.xlu1 %891 }
 0x5cc   :  { %v899_v48 = vadd.f32 %v892_v47, %v885_v45  ;;  %v901_v49 = vadd.f32 %v892_v47, %v887_v46 }
 0x5ce   :  { %903 = vst [vmem:[#allocation10] sm:$0xff] %v899_v48  ;;  %905 = vst [vmem:[#allocation10 + $0x10] sm:$0xff] %v901_v49 }
 0x5cf   :  { %v897_v52 = vpop.permute.xlu1 %896 }
 0x5d0   :  { %v900_v53 = vadd.f32 %v897_v52, %v886_v50  ;;  %v902_v54 = vadd.f32 %v897_v52, %v888_v51 }
 0x5d2   :  { %904 = vst [vmem:[#allocation10 + $0x8] sm:$0xff] %v900_v53  ;;  %906 = vst [vmem:[#allocation10 + $0x18] sm:$0xff] %v902_v54 }
 0x5d3   :  { %1267 = shalt.err (!%p1264_p8)
}
 0x5d4   :  { %s1268_s15 = scalar_lea.hbm %s1487_s9, 512 }
 0x5d5   :  { %p1269_p9 = scmp.ne.s32.totalorder %s1487_s9, %s1268_s15  ;;  %p1272_p10 = scmp.lt.u32.totalorder %s1268_s15, %s1487_s9 }
 0x5d7   :  { %p1274_p11 = pnand %p1272_p10, %p1269_p9 }
 0x5d9   :  { %1277 = shalt.err (!%p1274_p11)
}
 0x5da   :  { %s1298_s5 = smov 128   ;;  %s1299_s19 = smov 8  }
 0x5db   :  { %918 = dma.vmem_to_hbm [thread:$0]  %s913_s12, 512, %s1487_s9, [#allocation4], %s1298_s5, %s1298_s5, %s1299_s19  }
 0x5dc   :  { %1284 = dma.done.wait [#allocation4], 512  }
 0x5dd   :  { %1285 = vsyncadd [#allocation4], 4294966784 }
 0x5de   :  { %922 = vsyncpa [#allocation3], 1 }
 0x5df   :  { %923 = vsyncpa [#allocation6], 1 }
 0x5e0   :  { %924 = vsyncpa [#allocation9], 1 }
 0x5e1   :  { %925 = vsyncpa [#allocation4], 1 }

</bundles_post_ra>
